<compile_context>
chip_gen: v6e
topology: v6e:2x2x1
jax: 0.10.0
libtpu: 0.0.40
codegen_flags: <defaults>
</compile_context>

<pallas_src>
import jax
import jax.numpy as jnp
from jax.experimental import pallas as pl
from jax.experimental.pallas import tpu as pltpu


def _round_up(x, m):
    return (x + m - 1) // m * m


def _expert_soup_kernel(x_ref, res_ref, wa_ref, ba_ref, wb_ref, bb_ref, o_ref):
    # Fused A / A1 projection: a single MXU pass over K = dim.
    #   ra[:, :r]  -> result1 repeated (column j*r4 + i  ==  result1[:, j])
    #   ra[:, r:]  -> result2 tiled    (column j*r4 + i  ==  result2[:, i])
    ra = jnp.dot(x_ref[...], wa_ref[...],
                 preferred_element_type=jnp.float32) + ba_ref[...]
    r = ra.shape[-1] // 2
    # Kronecker activation (already in the permuted j*r4+i ordering), no
    # reshape/gather needed — just an elementwise product of two lane slices.
    # TODO(synk): optional `act` activation (act=None in this module config)
    # would be applied to `kron` here.
    kron = ra[:, :r] * ra[:, r:]
    out = jnp.dot(kron.astype(wb_ref.dtype), wb_ref[...],
                  preferred_element_type=jnp.float32)
    o_ref[...] = (out + bb_ref[...] + res_ref[...].astype(jnp.float32)
                  ).astype(o_ref.dtype)


def expert_soup_forward(x, residual, wA, bA, wA1, bA1, wB, bB, *, row_tile=256):
    """Fused inference-level-3 ("soup") ExpertSoup forward.

    x, residual : [..., dim]
    wA  : [4, dim],   bA  : [4]        (soup-mixed MoA_A)
    wA1 : [r/4, dim], bA1 : [r/4]      (soup-mixed MoA_A1)
    wB  : [dim, r],   bB  : [dim]      (soup-mixed MoA_B)
    """
    orig_shape = x.shape
    dim = wA.shape[1]
    r4 = wA1.shape[0]
    r = wB.shape[1]
    assert r == 4 * r4 and wB.shape[0] == dim and x.shape[-1] == dim

    xf = x.reshape(-1, dim)
    rf = residual.reshape(-1, dim).astype(x.dtype)
    n = xf.shape[0]
    itemsize = jnp.dtype(x.dtype).itemsize
    f32 = jnp.float32
    two_r = 2 * r

    # --- lane-dense feature dim, sublane-aligned row tiles -------------------
    dim_p = _round_up(dim, 128)

    # Cap the row tile so the 3 big streams (x, residual, out), double
    # buffered, stay well under v7x's 64 MiB physical VMEM.
    budget = 48 << 20
    max_rows = max(8, (budget // (6 * dim_p * itemsize)) // 8 * 8)
    row_tile = max(8, min(row_tile, max_rows, _round_up(n, 8)))
    row_tile = _round_up(row_tile, 8)
    n_p = _round_up(n, row_tile)

    # --- host-side weight prep (tiny, done once) -----------------------------
    # Expanded + fused A projection weight: (dim, 2r).
    waT_exp = jnp.repeat(wA.astype(f32).T, r4, axis=1)        # (dim, r)
    wa1T_exp = jnp.tile(wA1.astype(f32).T, (1, 4))            # (dim, r)
    w_big = jnp.concatenate([waT_exp, wa1T_exp], axis=1)      # (dim, 2r)
    b_big = jnp.concatenate([jnp.repeat(bA.astype(f32), r4),
                             jnp.tile(bA1.astype(f32), 4)]).reshape(1, two_r)

    # MoA_B weight with rows permuted to the j*r4+i ordering: wb_perm[j*r4+i]
    # == wB.T[i*4+j], matching the expanded Kronecker column ordering.
    wb_perm = (wB.astype(f32).T.reshape(r4, 4, dim)
               .transpose(1, 0, 2).reshape(r, dim))           # (r, dim)

    # --- zero-pad activations / weights to the padded shapes -----------------
    xf = jnp.pad(xf, ((0, n_p - n), (0, dim_p - dim)))
    rf = jnp.pad(rf, ((0, n_p - n), (0, dim_p - dim)))
    w_big = jnp.pad(w_big, ((0, dim_p - dim), (0, 0))).astype(x.dtype)
    wb_perm = jnp.pad(wb_perm, ((0, 0), (0, dim_p - dim))).astype(x.dtype)
    bb = jnp.pad(bB.astype(f32), (0, dim_p - dim)).reshape(1, dim_p)

    grid = (n_p // row_tile,)
    vmem_need = (6 * row_tile * dim_p * itemsize                 # x/res/out, 2-buf
                 + 2 * (dim_p * two_r + r * dim_p) * itemsize    # weights, 2-buf
                 + 4 * dim_p * 4 + (4 << 20))                    # biases + slack
    vmem_limit = int(min(max(vmem_need, 32 << 20), 100 << 20))

    out = pl.pallas_call(
        _expert_soup_kernel,
        out_shape=jax.ShapeDtypeStruct((n_p, dim_p), x.dtype),
        grid_spec=pltpu.PrefetchScalarGridSpec(
            num_scalar_prefetch=0,
            grid=grid,
            in_specs=[
                pl.BlockSpec((row_tile, dim_p), lambda i: (i, 0)),   # x
                pl.BlockSpec((row_tile, dim_p), lambda i: (i, 0)),   # residual
                pl.BlockSpec((dim_p, two_r), lambda i: (0, 0)),      # fused A weight
                pl.BlockSpec((1, two_r), lambda i: (0, 0)),          # fused A bias
                pl.BlockSpec((r, dim_p), lambda i: (0, 0)),          # permuted B weight
                pl.BlockSpec((1, dim_p), lambda i: (0, 0)),          # B bias
            ],
            out_specs=pl.BlockSpec((row_tile, dim_p), lambda i: (i, 0)),
        ),
        compiler_params=pltpu.CompilerParams(
            dimension_semantics=("parallel",),
            vmem_limit_bytes=vmem_limit),
    )(xf, rf, w_big, b_big, wb_perm, bb)

    return out[:n, :dim].reshape(orig_shape)


if __name__ == "__main__":
    key = jax.random.PRNGKey(0)
    B, S, DIM, R, NUM_EXPERT = 2, 8, 32, 16, 2
    R4 = R // 4
    keys = jax.random.split(key, 9)

    x = jax.random.normal(keys[0], (B, S, DIM), jnp.float32)
    residual = jax.random.normal(keys[1], (B, S, DIM), jnp.float32)

    # --- deterministic parameter setup (plain-JAX glue) ----------------------
    # MoA_A: num_expert Linear(dim, 4) experts mixed by softmax(expert scores)
    wA_experts = jax.random.normal(keys[2], (NUM_EXPERT, 4, DIM), jnp.float32) * 0.1
    bA_experts = jax.random.normal(keys[3], (NUM_EXPERT, 4), jnp.float32) * 0.1
    scoreA = jax.random.uniform(keys[4], (NUM_EXPERT,), jnp.float32)
    gA = jax.nn.softmax(scoreA)
    wA = jnp.einsum('e,eod->od', gA, wA_experts)          # (4, dim)
    bA = jnp.einsum('e,eo->o', gA, bA_experts)            # (4,)

    # MoA_A1: single expert Linear(dim, r//4) (softmax over one score == 1)
    wA1 = jax.random.normal(keys[5], (R4, DIM), jnp.float32) * 0.1
    bA1 = jax.random.normal(keys[6], (R4,), jnp.float32) * 0.1

    # MoA_B: single expert Linear(r, dim)
    wB = jax.random.normal(keys[7], (DIM, R), jnp.float32) * 0.1
    bB = jax.random.normal(keys[8], (DIM,), jnp.float32) * 0.1

    # --- Pallas kernel --------------------------------------------------------
    out = jax.block_until_ready(
        expert_soup_forward(x, residual, wA, bA, wA1, bA1, wB, bB))

    # --- plain-JAX reference check (same math as the PyTorch module) ---------
    r1 = x @ wA.T + bA
    r2 = x @ wA1.T + bA1
    kron = (r2[..., :, None] * r1[..., None, :]).reshape(B, S, R)
    ref = kron @ wB.T + bB + residual
    assert jnp.allclose(out, ref, atol=1e-4, rtol=1e-4), "mismatch vs reference"

    print("KERNEL_OK")
</pallas_src>

<mosaic_0001>
module attributes {stable_mosaic.version = 11 : i64} {
  func.func @_expert_soup_kernel(%arg0: i32, %arg1: memref<16x128xf32, #tpu.memory_space<vmem>>, %arg2: memref<16x128xf32, #tpu.memory_space<vmem>>, %arg3: memref<128x32xf32, #tpu.memory_space<vmem>>, %arg4: memref<1x32xf32, #tpu.memory_space<vmem>>, %arg5: memref<16x128xf32, #tpu.memory_space<vmem>>, %arg6: memref<1x128xf32, #tpu.memory_space<vmem>>, %arg7: memref<16x128xf32, #tpu.memory_space<vmem>>) attributes {dimension_semantics = [#tpu.dimension_semantics<parallel>], iteration_bounds = array<i64: 1>, scalar_prefetch = 0 : i64, scratch_operands = 0 : i64, tpu.core_type = #tpu.core_type<tc>, window_params = [{transform_indices = @transform_0, window_bounds = array<i64: 16, 128>}, {transform_indices = @transform_1, window_bounds = array<i64: 16, 128>}, {pipeline_mode = #tpu.pipeline_mode<synchronous>, transform_indices = @transform_2, window_bounds = array<i64: 128, 32>}, {pipeline_mode = #tpu.pipeline_mode<synchronous>, transform_indices = @transform_3, window_bounds = array<i64: 1, 32>}, {pipeline_mode = #tpu.pipeline_mode<synchronous>, transform_indices = @transform_4, window_bounds = array<i64: 16, 128>}, {pipeline_mode = #tpu.pipeline_mode<synchronous>, transform_indices = @transform_5, window_bounds = array<i64: 1, 128>}, {transform_indices = @transform_6, window_bounds = array<i64: 16, 128>}]} {
    %c0 = arith.constant 0 : index
    %c0_0 = arith.constant 0 : index
    %0 = vector.load %arg1[%c0, %c0_0] : memref<16x128xf32, #tpu.memory_space<vmem>>, vector<16x128xf32>
    %c0_1 = arith.constant 0 : index
    %c0_2 = arith.constant 0 : index
    %1 = vector.load %arg3[%c0_1, %c0_2] : memref<128x32xf32, #tpu.memory_space<vmem>>, vector<128x32xf32>
    %cst = arith.constant dense<0.000000e+00> : vector<16x32xf32>
    %2 = tpu.matmul %0, %1, %cst {dimension_numbers = #tpu.dot_dimension_numbers<[1], [0], [0], [1], [0, 0, 1, 1], [], []>} : vector<16x128xf32>, vector<128x32xf32>, vector<16x32xf32> -> vector<16x32xf32>
    %c0_3 = arith.constant 0 : index
    %c0_4 = arith.constant 0 : index
    %3 = vector.load %arg4[%c0_3, %c0_4] : memref<1x32xf32, #tpu.memory_space<vmem>>, vector<1x32xf32>
    %4 = vector.broadcast %3 : vector<1x32xf32> to vector<16x32xf32>
    %5 = arith.addf %2, %4 : vector<16x32xf32>
    %6 = vector.extract_strided_slice %5 {offsets = [0, 0], sizes = [16, 16], strides = [1, 1]} : vector<16x32xf32> to vector<16x16xf32>
    %7 = vector.extract_strided_slice %5 {offsets = [0, 16], sizes = [16, 16], strides = [1, 1]} : vector<16x32xf32> to vector<16x16xf32>
    %8 = arith.mulf %6, %7 : vector<16x16xf32>
    %c0_5 = arith.constant 0 : index
    %c0_6 = arith.constant 0 : index
    %9 = vector.load %arg5[%c0_5, %c0_6] : memref<16x128xf32, #tpu.memory_space<vmem>>, vector<16x128xf32>
    %cst_7 = arith.constant dense<0.000000e+00> : vector<16x128xf32>
    %10 = tpu.matmul %8, %9, %cst_7 {dimension_numbers = #tpu.dot_dimension_numbers<[1], [0], [0], [1], [0, 0, 1, 1], [], []>} : vector<16x16xf32>, vector<16x128xf32>, vector<16x128xf32> -> vector<16x128xf32>
    %c0_8 = arith.constant 0 : index
    %c0_9 = arith.constant 0 : index
    %11 = vector.load %arg6[%c0_8, %c0_9] : memref<1x128xf32, #tpu.memory_space<vmem>>, vector<1x128xf32>
    %12 = vector.broadcast %11 : vector<1x128xf32> to vector<16x128xf32>
    %13 = arith.addf %10, %12 : vector<16x128xf32>
    %c0_10 = arith.constant 0 : index
    %c0_11 = arith.constant 0 : index
    %14 = vector.load %arg2[%c0_10, %c0_11] : memref<16x128xf32, #tpu.memory_space<vmem>>, vector<16x128xf32>
    %15 = arith.addf %13, %14 : vector<16x128xf32>
    %c0_12 = arith.constant 0 : index
    %c0_13 = arith.constant 0 : index
    %16 = vector.load %arg7[%c0_12, %c0_13] : memref<16x128xf32, #tpu.memory_space<vmem>>, vector<16x128xf32>
    tpu.vector_store %arg7[%c0_12, %c0_13], %15 {strides = array<i32>} : memref<16x128xf32, #tpu.memory_space<vmem>>, vector<16x128xf32>,
    return
  }
  func.func @transform_0(%arg0: i32) -> (i32, i32) {
    %c0_i32 = arith.constant 0 : i32
    %c0_i32_0 = arith.constant 0 : i32
    return %arg0, %c0_i32 : i32, i32
  }
  func.func @transform_1(%arg0: i32) -> (i32, i32) {
    %c0_i32 = arith.constant 0 : i32
    %c0_i32_0 = arith.constant 0 : i32
    return %arg0, %c0_i32 : i32, i32
  }
  func.func @transform_2(%arg0: i32) -> (i32, i32) {
    %c0_i32 = arith.constant 0 : i32
    %c0_i32_0 = arith.constant 0 : i32
    %c0_i32_1 = arith.constant 0 : i32
    return %c0_i32, %c0_i32_0 : i32, i32
  }
  func.func @transform_3(%arg0: i32) -> (i32, i32) {
    %c0_i32 = arith.constant 0 : i32
    %c0_i32_0 = arith.constant 0 : i32
    %c0_i32_1 = arith.constant 0 : i32
    return %c0_i32, %c0_i32_0 : i32, i32
  }
  func.func @transform_4(%arg0: i32) -> (i32, i32) {
    %c0_i32 = arith.constant 0 : i32
    %c0_i32_0 = arith.constant 0 : i32
    %c0_i32_1 = arith.constant 0 : i32
    return %c0_i32, %c0_i32_0 : i32, i32
  }
  func.func @transform_5(%arg0: i32) -> (i32, i32) {
    %c0_i32 = arith.constant 0 : i32
    %c0_i32_0 = arith.constant 0 : i32
    %c0_i32_1 = arith.constant 0 : i32
    return %c0_i32, %c0_i32_0 : i32, i32
  }
  func.func @transform_6(%arg0: i32) -> (i32, i32) {
    %c0_i32 = arith.constant 0 : i32
    %c0_i32_0 = arith.constant 0 : i32
    return %arg0, %c0_i32 : i32, i32
  }
}

</mosaic_0001>

<bundles_post_ra>
// kernel: tpu_custom_call.1
= control target key start
LH: loop header
LB: loop body
LE: loop exit
PB: predicated region body
PF: predicated region fallthrough
CT: control target
= control target key end

     0   :  { %s455_s0 = inlined_call_operand.vmem [shape: f32[16,128], index: 0, kind: input, shape index: {}]   ;;  %s456_s1 = inlined_call_operand.vmem [shape: f32[16,128], index: 1, kind: input, shape index: {}]   ;;  %s457_s2 = inlined_call_operand.vmem [shape: f32[128,32], index: 2, kind: input, shape index: {}]   ;;  %s458_s3 = inlined_call_operand.vmem [shape: f32[1,32], index: 3, kind: input, shape index: {}]   ;;  %s459_s4 = inlined_call_operand.vmem [shape: f32[16,128], index: 4, kind: input, shape index: {}]   ;;  %s460_s5 = inlined_call_operand.vmem [shape: f32[1,128], index: 5, kind: input, shape index: {}]   ;;  %s461_s6 = inlined_call_operand.hbm [shape: f32[16,128], index: 6, kind: output, shape index: {}]  }
   0x1   :  { %v41_v0 = vld [vmem:[%s457_s2 + $0x78] sm:$0xff]  ;;  %v40_v1 = vld [vmem:[%s457_s2 + $0x70] sm:$0xff]  ;;  %v39_v2 = vld [vmem:[%s457_s2 + $0x68] sm:$0xff] }
   0x2   :  { %273 = vmatprep.subr.mxu0 %v41_v0  ;;  %v38_v3 = vld [vmem:[%s457_s2 + $0x60] sm:$0xff]  ;;  %v37_v5 = vld [vmem:[%s457_s2 + $0x58] sm:$0xff] }
   0x3   :  { %274 = vmatpush3.msra.mxu0 %v41_v0  ;;  %v24_v4 = vld [vmem:[%s455_s0] sm:$0xff] }
   0x4   :  { %275 = vmatprep.subr.mxu0 %v40_v1  ;;  %305 = vmatprep.mubr.f32.mxu0 %v24_v4 }
   0x5   :  { %276 = vmatpush3.msra.mxu0 %v40_v1 }
   0x6   :  { %277 = vmatprep.subr.mxu0 %v39_v2 }
   0x7   :  { %278 = vmatpush3.msra.mxu0 %v39_v2 }
   0x8   :  { %11 = vsyncpa [#allocation3], 0  ;;  %279 = vmatprep.subr.mxu0 %v38_v3  ;;  %v36_v6 = vld [vmem:[%s457_s2 + $0x50] sm:$0xff]  ;;  %v35_v7 = vld [vmem:[%s457_s2 + $0x48] sm:$0xff]  ;;  %vm143_vm0 = vcmask 130048   ;;  %s342_s16 = smov [#allocation2]  }
   0x9   :  { %280 = vmatpush3.msra.mxu0 %v38_v3  ;;  %v34_v8 = vld [vmem:[%s457_s2 + $0x40] sm:$0xff]  ;;  %v33_v9 = vld [vmem:[%s457_s2 + $0x38] sm:$0xff]  ;;  %v32_v10 = vld [vmem:[%s457_s2 + $0x30] sm:$0xff]  ;;  %s236_s17 = sshll.u32 %s342_s16, 4  ;;  %s237_s17 = int_to_ptr.vmem [resolvable:$true] %s236_s17 }
   0xa   :  { %281 = vmatprep.subr.mxu0 %v37_v5  ;;  %v31_v11 = vld [vmem:[%s457_s2 + $0x28] sm:$0xff]  ;;  %v30_v12 = vld [vmem:[%s457_s2 + $0x20] sm:$0xff]  ;;  %v29_v13 = vld [vmem:[%s457_s2 + $0x18] sm:$0xff]  ;;  %p324_p1 = scmp.lt.s32.totalorder %s237_s17, %s237_s17 }
   0xb   :  { %282 = vmatpush3.msra.mxu0 %v37_v5  ;;  %v28_v14 = vld [vmem:[%s457_s2 + $0x10] sm:$0xff]  ;;  %v27_v15 = vld [vmem:[%s457_s2 + $0x8] sm:$0xff]  ;;  %v26_v16 = vld [vmem:[%s457_s2] sm:$0xff] }
   0xc   :  { %283 = vmatprep.subr.mxu0 %v36_v6  ;;  %v25_v17 = vld [vmem:[%s455_s0 + $0x8] sm:$0xff]  ;;  %v134_v19 = vld [vmem:[%s459_s4] sm:$0xff]  ;;  %s341_s0 = smov 112  }
   0xd   :  { %284 = vmatpush3.msra.mxu0 %v36_v6  ;;  %v135_v18 = vld [vmem:[%s459_s4 + $0x8] sm:$0xff]  ;;  %v247_v21 = vld [vmem:[%s458_s3] ss:$0 sm:$0xff] }
   0xe   :  { %285 = vmatprep.subr.mxu0 %v35_v7  ;;  %308 = vmatprep.subr.mxu1 %v135_v18  ;;  %v248_v29 = vld [vmem:[%s460_s5] ss:$0 sm:$0xff]  ;;  %v226_v31 = vld [vmem:[%s456_s1 + $0x8] sm:$0xff]  ;;  %s319_s5 = scalar_lea.vmem %s237_s17, 256 }
   0xf   :  { %286 = vmatpush3.msra.mxu0 %v35_v7  ;;  %309 = vmatpush3.msra.mxu1 %v135_v18  ;;  %v225_v34 = vld [vmem:[%s456_s1] sm:$0xff]  ;;  %p320_p0 = scmp.ne.s32.totalorder %s237_s17, %s319_s5  ;;  %p325_p2 = scmp.lt.s32.totalorder %s319_s5, %s319_s5 }
  0x10   :  { %287 = vmatprep.subr.mxu0 %v34_v8  ;;  %310 = vmatprep.subr.mxu1 %v134_v19 }
  0x11   :  { %288 = vmatpush3.msra.mxu0 %v34_v8  ;;  %311 = vmatpush3.msra.mxu1 %v134_v19  ;;  %p326_p3 = por %p325_p2, %p324_p1 }
  0x12   :  { %289 = vmatprep.subr.mxu0 %v33_v9 }
  0x13   :  { %290 = vmatpush3.msra.mxu0 %v33_v9  ;;  %p327_p4 = pnand %p326_p3, %p320_p0 }
  0x14   :  { %291 = vmatprep.subr.mxu0 %v32_v10 }
  0x15   :  { %292 = vmatpush3.msra.mxu0 %v32_v10 }
  0x16   :  { %293 = vmatprep.subr.mxu0 %v31_v11 }
  0x17   :  { %294 = vmatpush3.msra.mxu0 %v31_v11 }
  0x18   :  { %295 = vmatprep.subr.mxu0 %v30_v12 }
  0x19   :  { %296 = vmatpush3.msra.mxu0 %v30_v12 }
  0x1a   :  { %297 = vmatprep.subr.mxu0 %v29_v13 }
  0x1b   :  { %298 = vmatpush3.msra.mxu0 %v29_v13 }
  0x1c   :  { %299 = vmatprep.subr.mxu0 %v28_v14 }
  0x1d   :  { %300 = vmatpush3.msra.mxu0 %v28_v14 }
  0x1e   :  { %301 = vmatprep.subr.mxu0 %v27_v15 }
  0x1f   :  { %302 = vmatpush3.msra.mxu0 %v27_v15 }
  0x20   :  { %303 = vmatprep.subr.mxu0 %v26_v16 }
  0x21   :  { %304 = vmatpush3.msra.mxu0 %v26_v16 }
  0x22   :  { %306 = vmatmul.mubr.f32.vlgmr.msra.gmra.mxu0 %v25_v17 }
  0xe2   :  { %v307_v20 = vpop.f32.mrf.mxu0 }
  0xe3   :  { %v121_v24 = vadd.f32 %v307_v20, %v247_v21 }
  0xe4   :  { %v115_v22 = vpop.f32.mrf.mxu0 }
  0xe5   :  { %v116_v23 = vadd.f32 %v247_v21, %v115_v22 }
  0xe7   :  { %126 = vrot.lane.b32.xlu0 %v116_v23, %s341_s0 }
  0xeb   :  { %128 = vrot.lane.b32.xlu0 %v121_v24, %s341_s0 }
 0x159   :  { %v127_v25 = vpop.permute.xlu0 %126 }
 0x15a   :  { %v132_v26 = vmul.f32 %v127_v25, %v116_v23 }
 0x15c   :  { %312 = vmatprep.mubr.msk.f32.mxu1 %vm143_vm0, %v132_v26 }
 0x15d   :  { %v129_v27 = vpop.permute.xlu0 %128 }
 0x15e   :  { %v133_v28 = vmul.f32 %v129_v27, %v121_v24 }
 0x160   :  { %313 = vmatmul.mubr.msk.f32.vlgmr.msra.gmra.mxu1 %vm143_vm0, %v133_v28 }
 0x220   :  { %v314_v30 = vpop.f32.mrf.mxu1 }
 0x221   :  { %v222_v32 = vadd.f32 %v314_v30, %v248_v29 }
 0x222   :  { %v216_v33 = vpop.f32.mrf.mxu1 }
 0x223   :  { %v228_v35 = vadd.f32 %v226_v31, %v222_v32  ;;  %v217_v36 = vadd.f32 %v248_v29, %v216_v33 }
 0x225   :  { %230 = vst [vmem:[#allocation2 + $0x8] sm:$0xff] %v228_v35  ;;  %v227_v37 = vadd.f32 %v225_v34, %v217_v36 }
 0x227   :  { %229 = vst [vmem:[#allocation2] sm:$0xff] %v227_v37 }
 0x228   :  { %330 = shalt.err (!%p327_p4)
}
 0x229   :  { %s343_s20 = smov 128   ;;  %s344_s21 = smov 8  }
 0x22a   :  { %242 = dma.vmem_to_hbm [thread:$0]  %s237_s17, 256, %s461_s6, [#allocation3], %s343_s20, %s343_s20, %s344_s21  }
 0x22b   :  { %339 = dma.done.wait [#allocation3], 256  }
 0x22c   :  { %340 = vsyncadd [#allocation3], 4294967040 }
 0x22d   :  { %246 = vsyncpa [#allocation3], 1 }

</bundles_post_ra>
